<compile_context>
chip_gen: v7x
topology: tpu7x:2x2x1
jax: 0.10.0
libtpu: 0.0.40
codegen_flags: <defaults>
</compile_context>

<pallas_src>
import jax
import jax.numpy as jnp
from jax.experimental import pallas as pl
from jax.experimental.pallas import tpu as pltpu


_INV_SQRT2 = 0.7071067811865476


def _gelu_exact(x):
    # PyTorch nn.GELU() default = exact erf formulation.
    return 0.5 * x * (1.0 + jax.lax.erf(x * _INV_SQRT2))


def _predictor_kernel(x_ref, policy_ref,
                      ln_g_ref, ln_b_ref,
                      w1a_ref, w1b_ref, b1a_ref, b1b_ref,
                      w2a_ref, w2b_ref, b2_ref,
                      w3_ref, b3_ref,
                      w4_ref, b4_ref,
                      out_ref):
    Bb, N, C = x_ref.shape
    half = C // 2

    x = x_ref[...].astype(jnp.float32).reshape(Bb * N, C)      # (Bb*N, C)
    policy = policy_ref[...].astype(jnp.float32)               # (Bb, N, 1)

    # ---- in_conv: LayerNorm(C) (single-pass stats) -> Linear(C, C) -> GELU ----
    inv_c = 1.0 / C
    s1 = jnp.sum(x, axis=-1, keepdims=True)
    s2 = jnp.sum(x * x, axis=-1, keepdims=True)
    mean = s1 * inv_c
    var = s2 * inv_c - mean * mean
    xn = (x - mean) * jax.lax.rsqrt(var + 1e-5)
    xn = (xn * ln_g_ref[...] + ln_b_ref[...]).astype(jnp.bfloat16)   # (Bb*N, C)

    # Linear(C, C) as two half-width matmuls: local / global channel halves are
    # produced directly -- no mid-tile channel slicing of a (Bb*N, C) buffer.
    h_loc = _gelu_exact(jnp.dot(xn, w1a_ref[...],
                                preferred_element_type=jnp.float32) + b1a_ref[...])
    h_glb = _gelu_exact(jnp.dot(xn, w1b_ref[...],
                                preferred_element_type=jnp.float32) + b1b_ref[...])

    # ---- policy-weighted global pool over tokens, per batch ----
    h_glb3 = h_glb.reshape(Bb, N, half)                        # leading-dim split only
    num = jnp.sum(h_glb3 * policy, axis=1)                     # (Bb, half)
    den = jnp.sum(policy, axis=1)                              # (Bb, 1)
    global_x = num / den                                       # (Bb, half)

    # ---- out_conv: (split) Linear -> GELU -> Linear -> GELU -> Linear -> LogSoftmax
    # concat([local, broadcast(global)]) @ w2  ==  local @ w2a + global @ w2b
    h2_loc = jnp.dot(h_loc.astype(jnp.bfloat16), w2a_ref[...],
                     preferred_element_type=jnp.float32) + b2_ref[...]   # (Bb*N, half)
    h2_glb = jnp.dot(global_x.astype(jnp.bfloat16), w2b_ref[...],
                     preferred_element_type=jnp.float32)                 # (Bb, half)
    h2 = _gelu_exact(h2_loc.reshape(Bb, N, half) + h2_glb.reshape(Bb, 1, half))
    h2 = h2.reshape(Bb * N, half)

    h3 = _gelu_exact(jnp.dot(h2.astype(jnp.bfloat16), w3_ref[...],
                             preferred_element_type=jnp.float32) + b3_ref[...])
    logits = jnp.dot(h3.astype(jnp.bfloat16), w4_ref[...],
                     preferred_element_type=jnp.float32) + b4_ref[...]   # (Bb*N, 2)

    m = jnp.max(logits, axis=-1, keepdims=True)
    s = logits - m
    lse = jnp.log(jnp.sum(jnp.exp(s), axis=-1, keepdims=True))
    out_ref[...] = (s - lse).reshape(Bb, N, 2).astype(out_ref.dtype)


def predictor_lg(x, policy, params, *, b_blk=None):
    """x: (B, N, C) f32, policy: (B, N, 1) f32 -> (B, N, 2) f32 log-probs."""
    B, N, C = x.shape
    half = C // 2

    # ---- batch-block sizing: large slabs, >=2 grid steps (dual-TC), divisor of B ----
    if b_blk is None:
        target_bytes = 4 << 20                         # ~4 MiB f32 x-slab per block
        cap = max(1, target_bytes // (N * C * 4))
        b_blk = int(min(cap, max(1, B // 2)))          # keep >=2 steps when B >= 2
    b_blk = max(1, min(int(b_blk), B))
    while B % b_blk:                                   # keep every block full
        b_blk -= 1
    grid = (B // b_blk,)

    # MXU operands in bf16 (f32 accumulation); biases / LayerNorm params stay f32.
    w1 = params["w1"].astype(jnp.bfloat16)
    w1a, w1b = w1[:, :half], w1[:, half:]              # split by output column
    b1a, b1b = params["b1"][:, :half], params["b1"][:, half:]
    w2a = params["w2"][:half].astype(jnp.bfloat16)     # "local" half of w2
    w2b = params["w2"][half:].astype(jnp.bfloat16)     # "global" half of w2
    w3 = params["w3"].astype(jnp.bfloat16)
    w4 = params["w4"].astype(jnp.bfloat16)
    weights = [params["ln_g"], params["ln_b"],
               w1a, w1b, b1a, b1b,
               w2a, w2b, params["b2"],
               w3, params["b3"],
               w4, params["b4"]]

    in_specs = [
        pl.BlockSpec((b_blk, N, C), lambda b: (b, 0, 0)),   # x slab
        pl.BlockSpec((b_blk, N, 1), lambda b: (b, 0, 0)),   # policy slab
    ] + [
        pl.BlockSpec(w.shape, lambda b, nd=w.ndim: (0,) * nd)  # grid-invariant weights
        for w in weights
    ]
    out_specs = pl.BlockSpec((b_blk, N, 2), lambda b: (b, 0, 0))

    # VMEM budget: double-buffered x/policy/out slabs + (double-buffered) weights,
    # plus headroom; capped so it stays v7x-safe (64 MiB physical).
    def _nbytes(a):
        return int(a.size) * a.dtype.itemsize
    blk_bytes = 2 * (b_blk * N * (C + 1 + 2) * 4)
    w_bytes = 2 * sum(_nbytes(w) for w in weights)
    vmem_limit = int(min(48 << 20, max(32 << 20, blk_bytes + w_bytes + (8 << 20))))

    return pl.pallas_call(
        _predictor_kernel,
        out_shape=jax.ShapeDtypeStruct((B, N, 2), jnp.float32),
        grid=grid,
        in_specs=in_specs,
        out_specs=out_specs,
        compiler_params=pltpu.CompilerParams(
            dimension_semantics=("parallel",),
            vmem_limit_bytes=vmem_limit),
    )(x, policy, *weights)


def predictor_lg_reference(x, policy, params):
    """Pure-JAX f32 reference matching the PyTorch forward exactly."""
    mean = jnp.mean(x, axis=-1, keepdims=True)
    var = jnp.mean((x - mean) ** 2, axis=-1, keepdims=True)
    xn = (x - mean) / jnp.sqrt(var + 1e-5)
    xn = xn * params["ln_g"][0] + params["ln_b"][0]
    h = _gelu_exact(xn @ params["w1"] + params["b1"][0])

    B, N, C = h.shape
    half = C // 2
    local_x = h[:, :, :half]
    global_x = jnp.sum(h[:, :, half:] * policy, axis=1, keepdims=True) / \
        jnp.sum(policy, axis=1, keepdims=True)
    feat = jnp.concatenate(
        [local_x, jnp.broadcast_to(global_x, (B, N, half))], axis=-1)

    h2 = _gelu_exact(feat @ params["w2"] + params["b2"][0])
    h3 = _gelu_exact(h2 @ params["w3"] + params["b3"][0])
    logits = h3 @ params["w4"] + params["b4"][0]
    return jax.nn.log_softmax(logits, axis=-1)


def init_params(key, embed_dim):
    """Deterministic synthetic parameters (PyTorch Linear stored pre-transposed as (in, out))."""
    C = embed_dim
    ks = jax.random.split(key, 8)
    scale = 0.05
    return {
        "ln_g": jnp.ones((1, C), jnp.float32),
        "ln_b": jnp.zeros((1, C), jnp.float32),
        "w1": scale * jax.random.normal(ks[0], (C, C), jnp.float32),
        "b1": scale * jax.random.normal(ks[1], (1, C), jnp.float32),
        "w2": scale * jax.random.normal(ks[2], (C, C // 2), jnp.float32),
        "b2": scale * jax.random.normal(ks[3], (1, C // 2), jnp.float32),
        "w3": scale * jax.random.normal(ks[4], (C // 2, C // 4), jnp.float32),
        "b3": scale * jax.random.normal(ks[5], (1, C // 4), jnp.float32),
        "w4": scale * jax.random.normal(ks[6], (C // 4, 2), jnp.float32),
        "b4": scale * jax.random.normal(ks[7], (1, 2), jnp.float32),
    }


if __name__ == "__main__":
    B, N, C = 2, 8, 32   # small embed_dim consistent with the module (divisible by 4)
    key = jax.random.PRNGKey(0)
    kx, kp, kw = jax.random.split(key, 3)

    x = jax.random.normal(kx, (B, N, C), jnp.float32)
    # policy: binary keep-mask per token, shaped (B, N, 1) like DynamicViT
    policy = (jax.random.uniform(kp, (B, N, 1)) > 0.3).astype(jnp.float32)
    # make sure no batch has an all-zero policy (would divide by zero, same as PyTorch)
    policy = policy.at[:, 0, :].set(1.0)

    params = init_params(kw, C)

    out = predictor_lg(x, policy, params)
    out = jax.block_until_ready(out)

    ref = predictor_lg_reference(x, policy, params)
    assert out.shape == (B, N, 2)
    # bf16 MXU operands (f32 accumulation) -> tolerance loosened vs pure-f32 reference
    assert jnp.max(jnp.abs(out - ref)) < 2e-2, "mismatch vs reference"

    print("KERNEL_OK")
</pallas_src>

<mosaic_0001>
module attributes {stable_mosaic.version = 11 : i64} {
  func.func @_predictor_kernel(%arg0: i32, %arg1: memref<1x8x32xf32, #tpu.memory_space<vmem>>, %arg2: memref<1x8x1xf32, #tpu.memory_space<vmem>>, %arg3: memref<1x32xf32, #tpu.memory_space<vmem>>, %arg4: memref<1x32xf32, #tpu.memory_space<vmem>>, %arg5: memref<32x16xbf16, #tpu.memory_space<vmem>>, %arg6: memref<32x16xbf16, #tpu.memory_space<vmem>>, %arg7: memref<1x16xf32, #tpu.memory_space<vmem>>, %arg8: memref<1x16xf32, #tpu.memory_space<vmem>>, %arg9: memref<16x16xbf16, #tpu.memory_space<vmem>>, %arg10: memref<16x16xbf16, #tpu.memory_space<vmem>>, %arg11: memref<1x16xf32, #tpu.memory_space<vmem>>, %arg12: memref<16x8xbf16, #tpu.memory_space<vmem>>, %arg13: memref<1x8xf32, #tpu.memory_space<vmem>>, %arg14: memref<8x2xbf16, #tpu.memory_space<vmem>>, %arg15: memref<1x2xf32, #tpu.memory_space<vmem>>, %arg16: memref<1x8x2xf32, #tpu.memory_space<vmem>>) attributes {dimension_semantics = [#tpu.dimension_semantics<parallel>], iteration_bounds = array<i64: 2>, scalar_prefetch = 0 : i64, scratch_operands = 0 : i64, tpu.core_type = #tpu.core_type<tc>, window_params = [{transform_indices = @transform_0, window_bounds = array<i64: 1, 8, 32>}, {transform_indices = @transform_1, window_bounds = array<i64: 1, 8, 1>}, {pipeline_mode = #tpu.pipeline_mode<synchronous>, transform_indices = @transform_2, window_bounds = array<i64: 1, 32>}, {pipeline_mode = #tpu.pipeline_mode<synchronous>, transform_indices = @transform_3, window_bounds = array<i64: 1, 32>}, {pipeline_mode = #tpu.pipeline_mode<synchronous>, transform_indices = @transform_4, window_bounds = array<i64: 32, 16>}, {pipeline_mode = #tpu.pipeline_mode<synchronous>, transform_indices = @transform_5, window_bounds = array<i64: 32, 16>}, {pipeline_mode = #tpu.pipeline_mode<synchronous>, transform_indices = @transform_6, window_bounds = array<i64: 1, 16>}, {pipeline_mode = #tpu.pipeline_mode<synchronous>, transform_indices = @transform_7, window_bounds = array<i64: 1, 16>}, {pipeline_mode = #tpu.pipeline_mode<synchronous>, transform_indices = @transform_8, window_bounds = array<i64: 16, 16>}, {pipeline_mode = #tpu.pipeline_mode<synchronous>, transform_indices = @transform_9, window_bounds = array<i64: 16, 16>}, {pipeline_mode = #tpu.pipeline_mode<synchronous>, transform_indices = @transform_10, window_bounds = array<i64: 1, 16>}, {pipeline_mode = #tpu.pipeline_mode<synchronous>, transform_indices = @transform_11, window_bounds = array<i64: 16, 8>}, {pipeline_mode = #tpu.pipeline_mode<synchronous>, transform_indices = @transform_12, window_bounds = array<i64: 1, 8>}, {pipeline_mode = #tpu.pipeline_mode<synchronous>, transform_indices = @transform_13, window_bounds = array<i64: 8, 2>}, {pipeline_mode = #tpu.pipeline_mode<synchronous>, transform_indices = @transform_14, window_bounds = array<i64: 1, 2>}, {transform_indices = @transform_15, window_bounds = array<i64: 1, 8, 2>}]} {
    %c0 = arith.constant 0 : index
    %c0_0 = arith.constant 0 : index
    %c0_1 = arith.constant 0 : index
    %0 = vector.load %arg1[%c0, %c0_0, %c0_1] : memref<1x8x32xf32, #tpu.memory_space<vmem>>, vector<1x8x32xf32>
    %1 = vector.shape_cast %0 : vector<1x8x32xf32> to vector<8x32xf32>
    %c0_2 = arith.constant 0 : index
    %c0_3 = arith.constant 0 : index
    %c0_4 = arith.constant 0 : index
    %2 = vector.load %arg2[%c0_2, %c0_3, %c0_4] : memref<1x8x1xf32, #tpu.memory_space<vmem>>, vector<1x8x1xf32>
    %cst = arith.constant dense<0.000000e+00> : vector<8xf32>
    %3 = vector.multi_reduction <add>, %1, %cst [1] : vector<8x32xf32> to vector<8xf32>
    %4 = vector.shape_cast %3 : vector<8xf32> to vector<8x1xf32>
    %5 = arith.mulf %1, %1 : vector<8x32xf32>
    %cst_5 = arith.constant dense<0.000000e+00> : vector<8xf32>
    %6 = vector.multi_reduction <add>, %5, %cst_5 [1] : vector<8x32xf32> to vector<8xf32>
    %7 = vector.shape_cast %6 : vector<8xf32> to vector<8x1xf32>
    %cst_6 = arith.constant 3.125000e-02 : f32
    %8 = vector.broadcast %cst_6 : f32 to vector<8x1xf32>
    %9 = arith.mulf %4, %8 : vector<8x1xf32>
    %cst_7 = arith.constant 3.125000e-02 : f32
    %10 = vector.broadcast %cst_7 : f32 to vector<8x1xf32>
    %11 = arith.mulf %7, %10 : vector<8x1xf32>
    %12 = arith.mulf %9, %9 : vector<8x1xf32>
    %13 = arith.subf %11, %12 : vector<8x1xf32>
    %14 = vector.broadcast %9 : vector<8x1xf32> to vector<8x32xf32>
    %15 = arith.subf %1, %14 : vector<8x32xf32>
    %cst_8 = arith.constant 9.99999974E-6 : f32
    %16 = vector.broadcast %cst_8 : f32 to vector<8x1xf32>
    %17 = arith.addf %13, %16 : vector<8x1xf32>
    %18 = math.rsqrt %17 : vector<8x1xf32>
    %19 = vector.broadcast %18 : vector<8x1xf32> to vector<8x32xf32>
    %20 = arith.mulf %15, %19 : vector<8x32xf32>
    %c0_9 = arith.constant 0 : index
    %c0_10 = arith.constant 0 : index
    %21 = vector.load %arg3[%c0_9, %c0_10] : memref<1x32xf32, #tpu.memory_space<vmem>>, vector<1x32xf32>
    %22 = vector.broadcast %21 : vector<1x32xf32> to vector<8x32xf32>
    %23 = arith.mulf %20, %22 : vector<8x32xf32>
    %c0_11 = arith.constant 0 : index
    %c0_12 = arith.constant 0 : index
    %24 = vector.load %arg4[%c0_11, %c0_12] : memref<1x32xf32, #tpu.memory_space<vmem>>, vector<1x32xf32>
    %25 = vector.broadcast %24 : vector<1x32xf32> to vector<8x32xf32>
    %26 = arith.addf %23, %25 : vector<8x32xf32>
    %27 = arith.truncf %26 : vector<8x32xf32> to vector<8x32xbf16>
    %c0_13 = arith.constant 0 : index
    %c0_14 = arith.constant 0 : index
    %28 = vector.load %arg5[%c0_13, %c0_14] : memref<32x16xbf16, #tpu.memory_space<vmem>>, vector<32x16xbf16>
    %cst_15 = arith.constant dense<0.000000e+00> : vector<8x16xf32>
    %29 = tpu.matmul %27, %28, %cst_15 {dimension_numbers = #tpu.dot_dimension_numbers<[1], [0], [0], [1], [0, 0, 1, 1], [], []>} : vector<8x32xbf16>, vector<32x16xbf16>, vector<8x16xf32> -> vector<8x16xf32>
    %c0_16 = arith.constant 0 : index
    %c0_17 = arith.constant 0 : index
    %30 = vector.load %arg7[%c0_16, %c0_17] : memref<1x16xf32, #tpu.memory_space<vmem>>, vector<1x16xf32>
    %31 = vector.broadcast %30 : vector<1x16xf32> to vector<8x16xf32>
    %32 = arith.addf %29, %31 : vector<8x16xf32>
    %cst_18 = arith.constant 5.000000e-01 : f32
    %33 = vector.broadcast %cst_18 : f32 to vector<8x16xf32>
    %34 = arith.mulf %33, %32 : vector<8x16xf32>
    %cst_19 = arith.constant 0.707106769 : f32
    %35 = vector.broadcast %cst_19 : f32 to vector<8x16xf32>
    %36 = arith.mulf %32, %35 : vector<8x16xf32>
    %37 = math.erf %36 : vector<8x16xf32>
    %cst_20 = arith.constant 1.000000e+00 : f32
    %38 = vector.broadcast %cst_20 : f32 to vector<8x16xf32>
    %39 = arith.addf %38, %37 : vector<8x16xf32>
    %40 = arith.mulf %34, %39 : vector<8x16xf32>
    %c0_21 = arith.constant 0 : index
    %c0_22 = arith.constant 0 : index
    %41 = vector.load %arg6[%c0_21, %c0_22] : memref<32x16xbf16, #tpu.memory_space<vmem>>, vector<32x16xbf16>
    %cst_23 = arith.constant dense<0.000000e+00> : vector<8x16xf32>
    %42 = tpu.matmul %27, %41, %cst_23 {dimension_numbers = #tpu.dot_dimension_numbers<[1], [0], [0], [1], [0, 0, 1, 1], [], []>} : vector<8x32xbf16>, vector<32x16xbf16>, vector<8x16xf32> -> vector<8x16xf32>
    %c0_24 = arith.constant 0 : index
    %c0_25 = arith.constant 0 : index
    %43 = vector.load %arg8[%c0_24, %c0_25] : memref<1x16xf32, #tpu.memory_space<vmem>>, vector<1x16xf32>
    %44 = vector.broadcast %43 : vector<1x16xf32> to vector<8x16xf32>
    %45 = arith.addf %42, %44 : vector<8x16xf32>
    %cst_26 = arith.constant 5.000000e-01 : f32
    %46 = vector.broadcast %cst_26 : f32 to vector<8x16xf32>
    %47 = arith.mulf %46, %45 : vector<8x16xf32>
    %cst_27 = arith.constant 0.707106769 : f32
    %48 = vector.broadcast %cst_27 : f32 to vector<8x16xf32>
    %49 = arith.mulf %45, %48 : vector<8x16xf32>
    %50 = math.erf %49 : vector<8x16xf32>
    %cst_28 = arith.constant 1.000000e+00 : f32
    %51 = vector.broadcast %cst_28 : f32 to vector<8x16xf32>
    %52 = arith.addf %51, %50 : vector<8x16xf32>
    %53 = arith.mulf %47, %52 : vector<8x16xf32>
    %54 = vector.shape_cast %53 : vector<8x16xf32> to vector<1x8x16xf32>
    %55 = vector.broadcast %2 : vector<1x8x1xf32> to vector<1x8x16xf32>
    %56 = arith.mulf %54, %55 : vector<1x8x16xf32>
    %cst_29 = arith.constant dense<0.000000e+00> : vector<1x16xf32>
    %57 = vector.multi_reduction <add>, %56, %cst_29 [1] : vector<1x8x16xf32> to vector<1x16xf32>
    %cst_30 = arith.constant dense<0.000000e+00> : vector<1x1xf32>
    %58 = vector.multi_reduction <add>, %2, %cst_30 [1] : vector<1x8x1xf32> to vector<1x1xf32>
    %59 = vector.broadcast %58 : vector<1x1xf32> to vector<1x16xf32>
    %60 = arith.divf %57, %59 : vector<1x16xf32>
    %61 = arith.truncf %40 : vector<8x16xf32> to vector<8x16xbf16>
    %c0_31 = arith.constant 0 : index
    %c0_32 = arith.constant 0 : index
    %62 = vector.load %arg9[%c0_31, %c0_32] : memref<16x16xbf16, #tpu.memory_space<vmem>>, vector<16x16xbf16>
    %cst_33 = arith.constant dense<0.000000e+00> : vector<8x16xf32>
    %63 = tpu.matmul %61, %62, %cst_33 {dimension_numbers = #tpu.dot_dimension_numbers<[1], [0], [0], [1], [0, 0, 1, 1], [], []>} : vector<8x16xbf16>, vector<16x16xbf16>, vector<8x16xf32> -> vector<8x16xf32>
    %c0_34 = arith.constant 0 : index
    %c0_35 = arith.constant 0 : index
    %64 = vector.load %arg11[%c0_34, %c0_35] : memref<1x16xf32, #tpu.memory_space<vmem>>, vector<1x16xf32>
    %65 = vector.broadcast %64 : vector<1x16xf32> to vector<8x16xf32>
    %66 = arith.addf %63, %65 : vector<8x16xf32>
    %67 = arith.truncf %60 : vector<1x16xf32> to vector<1x16xbf16>
    %c0_36 = arith.constant 0 : index
    %c0_37 = arith.constant 0 : index
    %68 = vector.load %arg10[%c0_36, %c0_37] : memref<16x16xbf16, #tpu.memory_space<vmem>>, vector<16x16xbf16>
    %cst_38 = arith.constant dense<0.000000e+00> : vector<1x16xf32>
    %69 = tpu.matmul %67, %68, %cst_38 {dimension_numbers = #tpu.dot_dimension_numbers<[1], [0], [0], [1], [0, 0, 1, 1], [], []>} : vector<1x16xbf16>, vector<16x16xbf16>, vector<1x16xf32> -> vector<1x16xf32>
    %70 = vector.shape_cast %66 : vector<8x16xf32> to vector<1x8x16xf32>
    %71 = vector.shape_cast %69 : vector<1x16xf32> to vector<1x1x16xf32>
    %72 = vector.broadcast %71 : vector<1x1x16xf32> to vector<1x8x16xf32>
    %73 = arith.addf %70, %72 : vector<1x8x16xf32>
    %cst_39 = arith.constant 5.000000e-01 : f32
    %74 = vector.broadcast %cst_39 : f32 to vector<1x8x16xf32>
    %75 = arith.mulf %74, %73 : vector<1x8x16xf32>
    %cst_40 = arith.constant 0.707106769 : f32
    %76 = vector.broadcast %cst_40 : f32 to vector<1x8x16xf32>
    %77 = arith.mulf %73, %76 : vector<1x8x16xf32>
    %78 = math.erf %77 : vector<1x8x16xf32>
    %cst_41 = arith.constant 1.000000e+00 : f32
    %79 = vector.broadcast %cst_41 : f32 to vector<1x8x16xf32>
    %80 = arith.addf %79, %78 : vector<1x8x16xf32>
    %81 = arith.mulf %75, %80 : vector<1x8x16xf32>
    %82 = vector.shape_cast %81 : vector<1x8x16xf32> to vector<8x16xf32>
    %83 = arith.truncf %82 : vector<8x16xf32> to vector<8x16xbf16>
    %c0_42 = arith.constant 0 : index
    %c0_43 = arith.constant 0 : index
    %84 = vector.load %arg12[%c0_42, %c0_43] : memref<16x8xbf16, #tpu.memory_space<vmem>>, vector<16x8xbf16>
    %cst_44 = arith.constant dense<0.000000e+00> : vector<8x8xf32>
    %85 = tpu.matmul %83, %84, %cst_44 {dimension_numbers = #tpu.dot_dimension_numbers<[1], [0], [0], [1], [0, 0, 1, 1], [], []>} : vector<8x16xbf16>, vector<16x8xbf16>, vector<8x8xf32> -> vector<8x8xf32>
    %c0_45 = arith.constant 0 : index
    %c0_46 = arith.constant 0 : index
    %86 = vector.load %arg13[%c0_45, %c0_46] : memref<1x8xf32, #tpu.memory_space<vmem>>, vector<1x8xf32>
    %87 = vector.broadcast %86 : vector<1x8xf32> to vector<8x8xf32>
    %88 = arith.addf %85, %87 : vector<8x8xf32>
    %cst_47 = arith.constant 5.000000e-01 : f32
    %89 = vector.broadcast %cst_47 : f32 to vector<8x8xf32>
    %90 = arith.mulf %89, %88 : vector<8x8xf32>
    %cst_48 = arith.constant 0.707106769 : f32
    %91 = vector.broadcast %cst_48 : f32 to vector<8x8xf32>
    %92 = arith.mulf %88, %91 : vector<8x8xf32>
    %93 = math.erf %92 : vector<8x8xf32>
    %cst_49 = arith.constant 1.000000e+00 : f32
    %94 = vector.broadcast %cst_49 : f32 to vector<8x8xf32>
    %95 = arith.addf %94, %93 : vector<8x8xf32>
    %96 = arith.mulf %90, %95 : vector<8x8xf32>
    %97 = arith.truncf %96 : vector<8x8xf32> to vector<8x8xbf16>
    %c0_50 = arith.constant 0 : index
    %c0_51 = arith.constant 0 : index
    %98 = vector.load %arg14[%c0_50, %c0_51] : memref<8x2xbf16, #tpu.memory_space<vmem>>, vector<8x2xbf16>
    %cst_52 = arith.constant dense<0.000000e+00> : vector<8x2xf32>
    %99 = tpu.matmul %97, %98, %cst_52 {dimension_numbers = #tpu.dot_dimension_numbers<[1], [0], [0], [1], [0, 0, 1, 1], [], []>} : vector<8x8xbf16>, vector<8x2xbf16>, vector<8x2xf32> -> vector<8x2xf32>
    %c0_53 = arith.constant 0 : index
    %c0_54 = arith.constant 0 : index
    %100 = vector.load %arg15[%c0_53, %c0_54] : memref<1x2xf32, #tpu.memory_space<vmem>>, vector<1x2xf32>
    %101 = vector.broadcast %100 : vector<1x2xf32> to vector<8x2xf32>
    %102 = arith.addf %99, %101 : vector<8x2xf32>
    %cst_55 = arith.constant dense<0xFF800000> : vector<8xf32>
    %103 = vector.multi_reduction <maximumf>, %102, %cst_55 [1] : vector<8x2xf32> to vector<8xf32>
    %104 = vector.shape_cast %103 : vector<8xf32> to vector<8x1xf32>
    %105 = vector.broadcast %104 : vector<8x1xf32> to vector<8x2xf32>
    %106 = arith.subf %102, %105 : vector<8x2xf32>
    %107 = math.exp %106 : vector<8x2xf32>
    %cst_56 = arith.constant dense<0.000000e+00> : vector<8xf32>
    %108 = vector.multi_reduction <add>, %107, %cst_56 [1] : vector<8x2xf32> to vector<8xf32>
    %109 = vector.shape_cast %108 : vector<8xf32> to vector<8x1xf32>
    %110 = math.log %109 : vector<8x1xf32>
    %111 = vector.broadcast %110 : vector<8x1xf32> to vector<8x2xf32>
    %112 = arith.subf %106, %111 : vector<8x2xf32>
    %113 = vector.shape_cast %112 : vector<8x2xf32> to vector<1x8x2xf32>
    %c0_57 = arith.constant 0 : index
    %c0_58 = arith.constant 0 : index
    %c0_59 = arith.constant 0 : index
    %114 = vector.load %arg16[%c0_57, %c0_58, %c0_59] : memref<1x8x2xf32, #tpu.memory_space<vmem>>, vector<1x8x2xf32>
    tpu.vector_store %arg16[%c0_57, %c0_58, %c0_59], %113 {strides = array<i32>} : memref<1x8x2xf32, #tpu.memory_space<vmem>>, vector<1x8x2xf32>,
    return
  }
  func.func @transform_0(%arg0: i32) -> (i32, i32, i32) {
    %c0_i32 = arith.constant 0 : i32
    %c0_i32_0 = arith.constant 0 : i32
    %c0_i32_1 = arith.constant 0 : i32
    return %arg0, %c0_i32, %c0_i32_0 : i32, i32, i32
  }
  func.func @transform_1(%arg0: i32) -> (i32, i32, i32) {
    %c0_i32 = arith.constant 0 : i32
    %c0_i32_0 = arith.constant 0 : i32
    %c0_i32_1 = arith.constant 0 : i32
    return %arg0, %c0_i32, %c0_i32_0 : i32, i32, i32
  }
  func.func @transform_2(%arg0: i32) -> (i32, i32) {
    %c0_i32 = arith.constant 0 : i32
    %c0_i32_0 = arith.constant 0 : i32
    %c0_i32_1 = arith.constant 0 : i32
    return %c0_i32, %c0_i32_0 : i32, i32
  }
  func.func @transform_3(%arg0: i32) -> (i32, i32) {
    %c0_i32 = arith.constant 0 : i32
    %c0_i32_0 = arith.constant 0 : i32
    %c0_i32_1 = arith.constant 0 : i32
    return %c0_i32, %c0_i32_0 : i32, i32
  }
  func.func @transform_4(%arg0: i32) -> (i32, i32) {
    %c0_i32 = arith.constant 0 : i32
    %c0_i32_0 = arith.constant 0 : i32
    %c0_i32_1 = arith.constant 0 : i32
    return %c0_i32, %c0_i32_0 : i32, i32
  }
  func.func @transform_5(%arg0: i32) -> (i32, i32) {
    %c0_i32 = arith.constant 0 : i32
    %c0_i32_0 = arith.constant 0 : i32
    %c0_i32_1 = arith.constant 0 : i32
    return %c0_i32, %c0_i32_0 : i32, i32
  }
  func.func @transform_6(%arg0: i32) -> (i32, i32) {
    %c0_i32 = arith.constant 0 : i32
    %c0_i32_0 = arith.constant 0 : i32
    %c0_i32_1 = arith.constant 0 : i32
    return %c0_i32, %c0_i32_0 : i32, i32
  }
  func.func @transform_7(%arg0: i32) -> (i32, i32) {
    %c0_i32 = arith.constant 0 : i32
    %c0_i32_0 = arith.constant 0 : i32
    %c0_i32_1 = arith.constant 0 : i32
    return %c0_i32, %c0_i32_0 : i32, i32
  }
  func.func @transform_8(%arg0: i32) -> (i32, i32) {
    %c0_i32 = arith.constant 0 : i32
    %c0_i32_0 = arith.constant 0 : i32
    %c0_i32_1 = arith.constant 0 : i32
    return %c0_i32, %c0_i32_0 : i32, i32
  }
  func.func @transform_9(%arg0: i32) -> (i32, i32) {
    %c0_i32 = arith.constant 0 : i32
    %c0_i32_0 = arith.constant 0 : i32
    %c0_i32_1 = arith.constant 0 : i32
    return %c0_i32, %c0_i32_0 : i32, i32
  }
  func.func @transform_10(%arg0: i32) -> (i32, i32) {
    %c0_i32 = arith.constant 0 : i32
    %c0_i32_0 = arith.constant 0 : i32
    %c0_i32_1 = arith.constant 0 : i32
    return %c0_i32, %c0_i32_0 : i32, i32
  }
  func.func @transform_11(%arg0: i32) -> (i32, i32) {
    %c0_i32 = arith.constant 0 : i32
    %c0_i32_0 = arith.constant 0 : i32
    %c0_i32_1 = arith.constant 0 : i32
    return %c0_i32, %c0_i32_0 : i32, i32
  }
  func.func @transform_12(%arg0: i32) -> (i32, i32) {
    %c0_i32 = arith.constant 0 : i32
    %c0_i32_0 = arith.constant 0 : i32
    %c0_i32_1 = arith.constant 0 : i32
    return %c0_i32, %c0_i32_0 : i32, i32
  }
  func.func @transform_13(%arg0: i32) -> (i32, i32) {
    %c0_i32 = arith.constant 0 : i32
    %c0_i32_0 = arith.constant 0 : i32
    %c0_i32_1 = arith.constant 0 : i32
    return %c0_i32, %c0_i32_0 : i32, i32
  }
  func.func @transform_14(%arg0: i32) -> (i32, i32) {
    %c0_i32 = arith.constant 0 : i32
    %c0_i32_0 = arith.constant 0 : i32
    %c0_i32_1 = arith.constant 0 : i32
    return %c0_i32, %c0_i32_0 : i32, i32
  }
  func.func @transform_15(%arg0: i32) -> (i32, i32, i32) {
    %c0_i32 = arith.constant 0 : i32
    %c0_i32_0 = arith.constant 0 : i32
    %c0_i32_1 = arith.constant 0 : i32
    return %arg0, %c0_i32, %c0_i32_0 : i32, i32, i32
  }
}

</mosaic_0001>

<bundles_post_ra>
// kernel: tpu_custom_call.1
= control target key start
LH: loop header
LB: loop body
LE: loop exit
PB: predicated region body
PF: predicated region fallthrough
CT: control target
= control target key end

     0   :  { %s1243_s18 = smov 0   ;;  %s1344_s0 = inlined_call_operand.vmem [shape: f32[2,8,32], index: 0, kind: input, shape index: {}]   ;;  %s1345_s1 = inlined_call_operand.vmem [shape: f32[2,8,1], index: 1, kind: input, shape index: {}]   ;;  %s1346_s2 = inlined_call_operand.vmem [shape: f32[1,32], index: 2, kind: input, shape index: {}]   ;;  %s1347_s3 = inlined_call_operand.vmem [shape: f32[1,32], index: 3, kind: input, shape index: {}]   ;;  %s1348_s4 = inlined_call_operand.vmem [shape: bf16[32,16], index: 4, kind: input, shape index: {}]   ;;  %s1349_s5 = inlined_call_operand.vmem [shape: bf16[32,16], index: 5, kind: input, shape index: {}]   ;;  %s1350_s6 = inlined_call_operand.vmem [shape: f32[1,16], index: 6, kind: input, shape index: {}]   ;;  %s1351_s7 = inlined_call_operand.vmem [shape: f32[1,16], index: 7, kind: input, shape index: {}]   ;;  %s1352_s8 = inlined_call_operand.vmem [shape: bf16[16,16], index: 8, kind: input, shape index: {}]   ;;  %s1353_s9 = inlined_call_operand.vmem [shape: bf16[16,16], index: 9, kind: input, shape index: {}]   ;;  %s1354_s10 = inlined_call_operand.vmem [shape: f32[1,16], index: 10, kind: input, shape index: {}]   ;;  %s1355_s11 = inlined_call_operand.vmem [shape: bf16[16,8], index: 11, kind: input, shape index: {}]   ;;  %s1356_s12 = inlined_call_operand.vmem [shape: f32[1,8], index: 12, kind: input, shape index: {}]   ;;  %s1357_s13 = inlined_call_operand.vmem [shape: bf16[8,2], index: 13, kind: input, shape index: {}]   ;;  %s1358_s14 = inlined_call_operand.vmem [shape: f32[1,2], index: 14, kind: input, shape index: {}]   ;;  %s1359_s15 = inlined_call_operand.vmem [shape: f32[2,8,2], index: 15, kind: output, shape index: {}]  }
   0x1 LB: > { %s1032_s19 = sadd.s32 4294967295, %s1158_s18   ;;  %p1036_p0 = scmp.ge.s32.totalorder %s1158_s18, 1  ;;  %s1158_s18 = sphi %s1243_s18, %s25_s18  }
   0x2   : > { %p445_p1 = scmp.lt.s32.totalorder %s1158_s18, 3 }
   0x4   : > { %p446_p2 = pnand %p1036_p0, %p445_p1 }
   0x5   : > { %p495_p3 = scmp.lt.s32.totalorder (!%p446_p2), %s1032_s19, 1  ;;  %vm510_vm0 = vcmask (!%p446_p2), 261120   ;;  %v1129_v4 = vld [vmem:[%s1348_s4] sm:$0xff] (!%p446_p2)   ;;  %v1160_v6 = vmov (!%p446_p2), 0.0   ;;  %v1131_v7 = vld [vmem:[%s1348_s4 + $0x8] sm:$0xff] (!%p446_p2)   ;;  %vm1161_vm1 = vmmov (!%p446_p2), 0  }
   0x6   : > { %449 = sbr.rel (%p446_p2) target bundleno = 1439 (0x59f), region = 80  ;;  %v1130_v5 = vld [vmem:[%s1349_s5] sm:$0xff] (!%p446_p2)   ;;  %1076 = vmatprep.subr.bf16.mxu0 (!%p446_p2), %v1160_v6  ;;  %1084 = vmatprep.subr.bf16.mxu1 (!%p446_p2), %v1160_v6  ;;  %v1132_v8 = vld [vmem:[%s1349_s5 + $0x8] sm:$0xff] (!%p446_p2)   ;;  %vm696_vm2 = vcmask (!%p446_p2), 7168   ;;  %v1162_v9 = vmov (!%p446_p2), 0   ;;  %vm688_vm3 = vcmask (!%p446_p2), 130048  }
   0x7   : > { %1077 = vmatpush3.bf16.msra.mxu0 (!%p446_p2), %v1129_v4  ;;  %1085 = vmatpush3.bf16.msra.mxu1 (!%p446_p2), %v1130_v5  ;;  %v1040_v27 = vld [vmem:[%s1346_s2] ss:$0 sm:$0xff] (!%p446_p2)  ;;  %vm909_vm4 = vcmask (!%p446_p2), 1043456   ;;  %vm905_vm5 = vcmask (!%p446_p2), 64512   ;;  %vm953_vm6 = vcmask (!%p446_p2), 15360  }
   0x8   : > { %1078 = vmatprep.subr.bf16.mxu0 (!%p446_p2), %v1160_v6  ;;  %1086 = vmatprep.subr.bf16.mxu1 (!%p446_p2), %v1160_v6  ;;  %v1041_v29 = vld [vmem:[%s1347_s3] ss:$0 sm:$0xff] (!%p446_p2) }
   0x9   : > { %1080 = vmatprep.mubr.msk.bf16.mxu0 (!%p446_p2), %vm1161_vm1, %v1160_v6  ;;  %1088 = vmatprep.mubr.msk.bf16.mxu1 (!%p446_p2), %vm1161_vm1, %v1160_v6  ;;  %v1133_v33 = vld [vmem:[%s1352_s8] sm:$0xff] (!%p446_p2)  }
   0xa   : > { %1127 = vset.pattern.permute.xlu1 (!%p446_p2), %v1162_v9  ;;  %1128 = vset.pattern.permute.xlu0 (!%p446_p2), %v1162_v9  ;;  %v1134_v34 = vld [vmem:[%s1353_s9] sm:$0xff] (!%p446_p2)  }
   0xb   : > { %1079 = vmatpush3.bf16.msra.mxu0 (!%p446_p2), %v1131_v7  ;;  %1087 = vmatpush3.bf16.msra.mxu1 (!%p446_p2), %v1132_v8  ;;  %v1042_v35 = vld [vmem:[%s1350_s6] ss:$0 sm:$0xff] (!%p446_p2) }
   0xc   : > { %1092 = vmatprep.subr.bf16.mxu0 (!%p446_p2), %v1160_v6  ;;  %1098 = vmatprep.subr.bf16.mxu1 (!%p446_p2), %v1160_v6  ;;  %v1046_v36 = vld [vmem:[%s1351_s7] ss:$0 sm:$0xff] (!%p446_p2) }
   0xd   : > { %s1361_s19 = smov (!%p495_p3, %s1032_s19), 1  ;;  %v1135_v8 = vld [vmem:[%s1355_s11] sm:$0xff]  }
   0xe   : > { %s1251_s20 = sshll.u32 %s1361_s19, 3 }
   0xf   : > { %s498_s23 = scalar_lea.vmem %s1344_s0, %s1251_s20  ;;  %s502_s21 = scalar_lea.vmem %s1345_s1, %s1251_s20 }
  0x10   : > { %v508_v0 = vld [vmem:[%s498_s23] sm:$0xff]  ;;  %s506_s19 = scalar_lea.vmem %s1359_s15, %s1251_s20 }
  0x11   : > { %v511_v1 = vsel %vm510_vm0, %v508_v0, 0.0  ;;  %v514_v2 = vmul.f32 %v508_v0, %v508_v0  ;;  %v509_v10 = vld [vmem:[%s502_s21] sm:$0xff] }
  0x12   : > { %512 = vadd.xlane.f32.xlu0 %v511_v1  ;;  %684 = vperm.xlu1 %1127, %v509_v10   ;;  %v697_v11 = vsel %vm696_vm2, %v509_v10, 0.0 }
  0x13   : > { %v515_v3 = vsel %vm510_vm0, %v514_v2, 0.0  ;;  %v698_v12 = vrot.slane %v697_v11, 4 }
  0x15   : > { %v699_v13 = vadd.f32 %v698_v12, %v697_v11 }
  0x16   : > { %516 = vadd.xlane.f32.xlu0 %v515_v3 }
  0x17   : > { %v700_v14 = vrot.slane %v699_v13, 2 }
  0x19   : > { %v701_v15 = vadd.f32 %v700_v14, %v699_v13  ;;  %v822_v13 = vlaneseq }
  0x1b   : > { %v702_v16 = vrot.slane %v701_v15, 1  ;;  %v823_v14 = vshrl.u32 %v822_v13, 7 }
  0x1d   : > { %v703_v17 = vadd.f32 %v702_v16, %v701_v15  ;;  %v824_v15 = vsub.s32 0, %v823_v14  ;;  %v1050_v16 = vld [vmem:[%s1354_s10] ss:$0 sm:$0xff] }
  0x1f   : > { %706 = vperm.xlu1 %1127, %v703_v17  }
  0x91   : > { %v685_v53 = vpop.permute.xlu1 %684 }
  0x9e   : > { %v707_v60 = vpop.permute.xlu1 %706 }
  0x9f   : > { %v513_v18 = vpop.xlane.xlu0 %512 }
  0xa0   : > { %v518_v19 = vmul.f32 0.03125, %v513_v18 }
  0xa2   : > { %v520_v21 = vmul.f32 %v518_v19, %v518_v19  ;;  %v522_v25 = vsub.f32 %v508_v0, %v518_v19 }
  0xa3   : > { %v517_v20 = vpop.xlane.xlu0 %516 }
  0xa4   : > { %v519_v22 = vmul.f32 0.03125, %v517_v20 }
  0xa6   : > { %v521_v23 = vsub.f32 %v519_v22, %v520_v21 }
  0xa8   : > { %v523_v24 = vadd.f32 1e-05, %v521_v23 }
  0xaa   : > { %1136 = vrsqrt.f32 %v523_v24 }
  0xb4   : > { %v1137_v26 = vpop.eup %1136 }
  0xb5   : > { %v525_v28 = vmul.f32 %v1137_v26, %v522_v25 }
  0xb7   : > { %v533_v30 = vmul.f32 %v1040_v27, %v525_v28 }
  0xb9   : > { %v541_v31 = vadd.f32 %v1041_v29, %v533_v30  ;;  %v897_v29 = vld [vmem:[%s1357_s13] sm:$0xf] }
  0xba   : > { %v911_v30 = vsel %vm909_vm4, %v897_v29, 0 }
  0xbb   : > { %v542_v32 = vpack.c.bf16 %v541_v31, %v541_v31  ;;  %v1055_v31 = vld [vmem:[%s1356_s12] ss:$0 sm:$0xff] }
  0xbd   : > { %1081 = vmatmul.mubr.msk.bf16.vlgmr.msra.gmra.mrb[0].mxu0 %vm510_vm0, %v542_v32  ;;  %1089 = vmatmul.mubr.msk.bf16.vlgmr.msra.gmra.mrb[0].mxu1 %vm510_vm0, %v542_v32 }
  0xbe   : > { %1094 = vmatprep.mubr.msk.bf16.mxu0 %vm1161_vm1, %v1160_v6  ;;  %1100 = vmatprep.mubr.msk.bf16.mxu1 %vm1161_vm1, %v1160_v6 }
  0xbf   : > { %1093 = vmatpush3.bf16.msra.mxu0 %v1133_v33  ;;  %1099 = vmatpush3.bf16.msra.mxu1 %v1134_v34 }
  0xc0   : > { %1104 = vmatprep.subr.bf16.mxu0 %v1160_v6  ;;  %1110 = vmatprep.subr.bf16.mxu1 %v1160_v6 }
 0x190   : > { %v603_v37 = vpop.f32.mrb[0].mxu0  ;;  %v671_v38 = vpop.f32.mrb[0].mxu1 }
 0x191   : > { %v604_v39 = vadd.f32 %v1042_v35, %v603_v37  ;;  %v672_v40 = vadd.f32 %v1046_v36, %v671_v38  ;;  %v1082_v41 = vpop.f32.mrb[1].mxu0  ;;  %v1090_v42 = vpop.f32.mrb[1].mxu1 }
 0x192   : > { %v606_v43 = vpop.f32.mrb[2].mxu0  ;;  %v674_v44 = vpop.f32.mrb[2].mxu1 }
 0x193   : > { %v610_v45 = vmul.f32 0.70710677, %v604_v39  ;;  %v678_v46 = vmul.f32 0.70710677, %v672_v40  ;;  %v1083_v47 = vpop.f32.mrb[3].mxu0  ;;  %v1091_v48 = vpop.f32.mrb[3].mxu1 }
 0x194   : > { %v609_v51 = vmul.f32 0.5, %v604_v39  ;;  %v677_v54 = vmul.f32 0.5, %v672_v40  ;;  %v1058_v43 = vld [vmem:[%s1358_s14] ss:$0 sm:$0xff] }
 0x195   : > { %1138 = verf.f32 %v610_v45 }
 0x196   : > { %1140 = verf.f32 %v678_v46 }
 0x197   : > { %1142 = vrcp.f32 %v707_v60 }
 0x19f   : > { %v1139_v49 = vpop.eup %1138 }
 0x1a0   : > { %v1141_v50 = vpop.eup %1140  ;;  %v612_v52 = vadd.f32 1.0, %v1139_v49 }
 0x1a1   : > { %v680_v55 = vadd.f32 1.0, %v1141_v50  ;;  %v1143_v4 = vpop.eup %1142 }
 0x1a2   : > { %v613_v56 = vmul.f32 %v612_v52, %v609_v51 }
 0x1a3   : > { %v681_v57 = vmul.f32 %v680_v55, %v677_v54 }
 0x1a4   : > { %v711_v58 = vpack.c.bf16 %v613_v56, %v613_v56 }
 0x1a5   : > { %v687_v59 = vmul.f32 %v685_v53, %v681_v57 }
 0x1a6   : > { %1095 = vmatmul.mubr.msk.bf16.vlgmr.msra.gmra.mrb[4].mxu0 %vm688_vm3, %v711_v58 }
 0x1a7   : > { %v689_v61 = vsel %vm688_vm3, %v687_v59, 0.0  ;;  %1106 = vmatprep.mubr.msk.bf16.mxu0 %vm1161_vm1, %v1160_v6  ;;  %1105 = vmatpush3.bf16.msra.mxu0 %v1135_v8 }
 0x1a8   : > { %v690_v62 = vrot.slane %v689_v61, 4 }
 0x1aa   : > { %v691_v63 = vadd.f32 %v690_v62, %v689_v61 }
 0x1ac   : > { %v692_v0 = vrot.slane %v691_v63, 2 }
 0x1ae   : > { %v693_v1 = vadd.f32 %v692_v0, %v691_v63 }
 0x1b0   : > { %v694_v2 = vrot.slane %v693_v1, 1 }
 0x1b2   : > { %v695_v3 = vadd.f32 %v694_v2, %v693_v1 }
 0x1b4   : > { %v710_v5 = vmul.f32 %v1143_v4, %v695_v3 }
 0x1b6   : > { %v770_v7 = vpack.c.bf16 %v710_v5, %v710_v5 }
 0x1b8   : > { %1101 = vmatmul.mubr.msk.bf16.vlgmr.msra.gmra.mrb[4].mxu1 %vm688_vm3, %v770_v7 }
 0x1b9   : > { %1112 = vmatprep.mubr.msk.bf16.mxu1 %vm1161_vm1, %v1160_v6  ;;  %1111 = vmatpush3.bf16.msra.mxu1 %v911_v30 }
 0x279   : > { %v764_v9 = vpop.f32.mrb[4].mxu0 }
 0x27a   : > { %v1096_v10 = vpop.f32.mrb[5].mxu0  ;;  %v765_v18 = vadd.f32 %v1050_v16, %v764_v9 }
 0x27b   : > { %v767_v11 = vpop.f32.mrb[6].mxu0 }
 0x27c   : > { %v1097_v12 = vpop.f32.mrb[7].mxu0 }
 0x28b   : > { %v816_v17 = vpop.f32.mrb[4].mxu1 }
 0x28c   : > { %v825_v19 = vrot.slane %v816_v17, %v824_v15  ;;  %v1102_v6 = vpop.f32.mrb[5].mxu1 }
 0x28d   : > { %v819_v20 = vpop.f32.mrb[6].mxu1 }
 0x28e   : > { %v826_v21 = vadd.f32 %v825_v19, %v765_v18  ;;  %v1103_v22 = vpop.f32.mrb[7].mxu1 }
 0x290   : > { %v828_v23 = vmul.f32 0.70710677, %v826_v21  ;;  %v827_v25 = vmul.f32 0.5, %v826_v21 }
 0x292   : > { %1144 = verf.f32 %v828_v23 }
 0x29c   : > { %v1145_v24 = vpop.eup %1144 }
 0x29d   : > { %v830_v26 = vadd.f32 1.0, %v1145_v24 }
 0x29f   : > { %v831_v27 = vmul.f32 %v830_v26, %v827_v25 }
 0x2a1   : > { %v832_v28 = vpack.c.bf16 %v831_v27, %v831_v27 }
 0x2a3   : > { %1107 = vmatmul.mubr.msk.bf16.vlgmr.msra.gmra.mrb[8].mxu0 %vm688_vm3, %v832_v28 }
 0x376   : > { %v885_v32 = vpop.f32.mrb[8].mxu0 }
 0x377   : > { %v886_v33 = vadd.f32 %v1055_v31, %v885_v32  ;;  %v1108_v34 = vpop.f32.mrb[9].mxu0 }
 0x378   : > { %v888_v35 = vpop.f32.mrb[10].mxu0 }
 0x379   : > { %v892_v36 = vmul.f32 0.70710677, %v886_v33  ;;  %v1109_v37 = vpop.f32.mrb[11].mxu0  ;;  %v891_v39 = vmul.f32 0.5, %v886_v33 }
 0x37b   : > { %1146 = verf.f32 %v892_v36 }
 0x385   : > { %v1147_v38 = vpop.eup %1146 }
 0x386   : > { %v894_v40 = vadd.f32 1.0, %v1147_v38 }
 0x388   : > { %v895_v41 = vmul.f32 %v894_v40, %v891_v39 }
 0x38a   : > { %v896_v42 = vpack.c.bf16 %v895_v41, %v895_v41 }
 0x38c   : > { %1113 = vmatmul.mubr.msk.bf16.vlgmr.msra.gmra.mrb[8].mxu1 %vm905_vm5, %v896_v42 }
 0x45f   : > { %v947_v44 = vpop.f32.mrb[8].mxu1 }
 0x460   : > { %v948_v45 = vadd.f32 %v1058_v43, %v947_v44  ;;  %v1114_v46 = vpop.f32.mrb[9].mxu1 }
 0x461   : > { %v950_v47 = vpop.f32.mrb[10].mxu1 }
 0x462   : > { %v1115_v48 = vpop.f32.mrb[11].mxu1  ;;  %v954_v49 = vsel %vm953_vm6, %v948_v45, -inf }
 0x463   : > { %955 = vmax.xlane.f32.xlu0 %v954_v49 }
 0x4f0   : > { %v956_v50 = vpop.xlane.xlu0 %955 }
 0x4f1   : > { %v957_v51 = vsub.f32 %v948_v45, %v956_v50 }
 0x4f3   : > { %v958_v52 = vmul.f32 1.442695, %v957_v51 }
 0x4f5   : > { %1148 = vpow2.f32 %v958_v52 }
 0x4ff   : > { %v1149_v53 = vpop.eup %1148 }
 0x500   : > { %v960_v54 = vsel %vm953_vm6, %v1149_v53, 0.0 }
 0x501   : > { %961 = vadd.xlane.f32.xlu1 %v960_v54 }
 0x58e   : > { %v962_v55 = vpop.xlane.xlu1 %961 }
 0x58f   : > { %1150 = vlog2.f32 %v962_v55 }
 0x599   : > { %v1151_v56 = vpop.eup %1150 }
 0x59a   : > { %v964_v57 = vmul.f32 0.6931472, %v1151_v56 }
 0x59c   : > { %v965_v58 = vsub.f32 %v957_v51, %v964_v57 }
 0x59e   : > { %966 = vst.msk [vmem:[%s506_s19] sm:$0xff] %vm953_vm6, %v965_v58 }
 0x59f PF: > { %s25_s18 = sadd.s32 1, %s1158_s18  }
 0x5a0   : > { %p22_p4 = scmp.ge.s32.totalorder %s25_s18, 4  }
 0x5a2   :  { %24 = sbr.rel (!%p22_p4) target bundleno = 1 (0x1), region = 113 }

</bundles_post_ra>
